<compile_context>
chip_gen: v7x
topology: tpu7x:2x2x1
jax: 0.10.0
libtpu: 0.0.40
codegen_flags: <defaults>
</compile_context>

<pallas_src>
import functools

import jax
import jax.numpy as jnp
from jax.experimental import pallas as pl
from jax.experimental.pallas import tpu as pltpu


def _round_up(x, m):
    return ((x + m - 1) // m) * m


# ---------------------------------------------------------------------------
# Pallas kernel: fused matmul + bias + (optional) ReLU, bf16 MXU / f32 epilogue
# ---------------------------------------------------------------------------
def _matmul_bias_act_kernel(x_ref, w_ref, b_ref, o_ref, *, relu):
    # x: (tm, K) bf16, w: (K, N) bf16, b: (1, N) f32 -> o: (tm, N)
    y = jnp.dot(x_ref[...], w_ref[...], preferred_element_type=jnp.float32)
    y = y + b_ref[...]
    if relu:
        y = jnp.maximum(y, 0.0)
    o_ref[...] = y.astype(o_ref.dtype)


def pallas_matmul_bias_act(x, w, b, *, relu, out_dtype=jnp.float32, tm_max=512):
    """y = relu?(x @ w + b) as an M-tiled Pallas GEMM."""
    M, K = x.shape
    N = w.shape[1]
    x = x.astype(jnp.bfloat16)
    w = w.astype(jnp.bfloat16)
    b = b.astype(jnp.float32).reshape(1, N)

    tm = min(tm_max, _round_up(M, 16))        # bf16 sublane packing -> multiple of 16
    Mp = _round_up(M, tm)
    if Mp != M:
        x = jnp.pad(x, ((0, Mp - M), (0, 0)))

    flops = 2 * Mp * K * N
    bytes_accessed = (Mp * K + K * N) * 2 + N * 4 + Mp * N * jnp.dtype(out_dtype).itemsize

    out = pl.pallas_call(
        functools.partial(_matmul_bias_act_kernel, relu=relu),
        out_shape=jax.ShapeDtypeStruct((Mp, N), out_dtype),
        grid=(Mp // tm,),
        in_specs=[
            pl.BlockSpec((tm, K), lambda i: (i, 0)),
            pl.BlockSpec((K, N), lambda i: (0, 0)),
            pl.BlockSpec((1, N), lambda i: (0, 0)),
        ],
        out_specs=pl.BlockSpec((tm, N), lambda i: (i, 0)),
        compiler_params=pltpu.CompilerParams(
            dimension_semantics=("parallel",),
            vmem_limit_bytes=32 * 1024 * 1024,   # safe on v5e/v6e/v7x, >> per-tile need
        ),
        cost_estimate=pl.CostEstimate(
            flops=int(flops), transcendentals=0, bytes_accessed=int(bytes_accessed)),
    )(x, w, b)
    return out[:M] if Mp != M else out


# ---------------------------------------------------------------------------
# Pallas kernel: fused fc_adv + fc_val + advantage + value + dueling combine
# ---------------------------------------------------------------------------
def _dueling_head_kernel(x_ref, w1_ref, b1_ref, w2_ref, b2_ref, q_ref, *, num_actions):
    # hidden = relu(x @ W1 + b1),  W1 = [W_fc_adv | W_fc_val]          : (K, 512)
    h = jnp.dot(x_ref[...], w1_ref[...], preferred_element_type=jnp.float32)
    h = jnp.maximum(h + b1_ref[...], 0.0)
    # [adv | val] = hidden @ W2 + b2,  W2 = blockdiag(W_adv, w_val)    : (512, A+1)
    av = jnp.dot(h.astype(jnp.bfloat16), w2_ref[...],
                 preferred_element_type=jnp.float32) + b2_ref[...]
    adv = av[:, :num_actions]
    val = av[:, num_actions:num_actions + 1]
    q_ref[...] = val + (adv - jnp.mean(adv, axis=1, keepdims=True))


def pallas_dueling_head(flat, w1, b1, w2, b2, *, tb_max=256):
    B, K = flat.shape
    H2 = w1.shape[1]          # 512
    A1 = w2.shape[1]          # num_actions + 1
    num_actions = A1 - 1
    flat = flat.astype(jnp.bfloat16)

    tb = min(tb_max, _round_up(B, 16))
    Bp = _round_up(B, tb)
    if Bp != B:
        flat = jnp.pad(flat, ((0, Bp - B), (0, 0)))

    flops = 2 * Bp * K * H2 + 2 * Bp * H2 * A1
    bytes_accessed = (Bp * K + K * H2 + H2 * A1) * 2 + (H2 + A1) * 4 + Bp * num_actions * 4

    q = pl.pallas_call(
        functools.partial(_dueling_head_kernel, num_actions=num_actions),
        out_shape=jax.ShapeDtypeStruct((Bp, num_actions), jnp.float32),
        grid=(Bp // tb,),
        in_specs=[
            pl.BlockSpec((tb, K), lambda i: (i, 0)),
            pl.BlockSpec((K, H2), lambda i: (0, 0)),
            pl.BlockSpec((1, H2), lambda i: (0, 0)),
            pl.BlockSpec((H2, A1), lambda i: (0, 0)),
            pl.BlockSpec((1, A1), lambda i: (0, 0)),
        ],
        out_specs=pl.BlockSpec((tb, num_actions), lambda i: (i, 0)),
        compiler_params=pltpu.CompilerParams(
            dimension_semantics=("parallel",),
            vmem_limit_bytes=32 * 1024 * 1024,
        ),
        cost_estimate=pl.CostEstimate(
            flops=int(flops), transcendentals=0, bytes_accessed=int(bytes_accessed)),
    )(flat,
      w1.astype(jnp.bfloat16), b1.astype(jnp.float32).reshape(1, H2),
      w2.astype(jnp.bfloat16), b2.astype(jnp.float32).reshape(1, A1))
    return q[:B] if Bp != B else q


# ---------------------------------------------------------------------------
# Conv = NHWC im2col (glue) + Pallas GEMM; output stays NHWC (no transposes)
# ---------------------------------------------------------------------------
def _im2col_nhwc(x, kh, kw, stride):
    # x: (B, H, W, C) -> patches (B*OH*OW, KH*KW*C) in (kh, kw, c) minor order.
    # TODO(synk): fuse im2col into the conv GEMM kernel (strided pl.ds reads)
    # to eliminate the ~4x patch-duplication HBM traffic of the conv stage.
    B, H, W, C = x.shape
    oh = (H - kh) // stride + 1
    ow = (W - kw) // stride + 1
    cols = []
    for i in range(kh):
        for j in range(kw):
            cols.append(x[:, i:i + stride * oh:stride, j:j + stride * ow:stride, :])
    p = jnp.stack(cols, axis=3)                    # (B, OH, OW, KH*KW, C)
    return p.reshape(B * oh * ow, kh * kw * C), oh, ow


def conv2d_relu_nhwc(x, w2d, b, *, kh, kw, stride):
    # x: NHWC; w2d: (KH*KW*C, O) pre-permuted from PyTorch (O, C, KH, KW).
    B = x.shape[0]
    O = w2d.shape[1]
    patches, oh, ow = _im2col_nhwc(x, kh, kw, stride)
    y = pallas_matmul_bias_act(patches, w2d, b, relu=True, out_dtype=jnp.bfloat16)
    return y.reshape(B, oh, ow, O)                 # already NHWC, no transpose


# ---------------------------------------------------------------------------
# Parameter preparation: PyTorch layout -> kernel-ready fused/bf16 layout
# ---------------------------------------------------------------------------
def _conv_w2d(w):
    # PyTorch (O, C, KH, KW) -> (KH*KW*C, O) matching _im2col_nhwc column order.
    O, C, kh, kw = w.shape
    return jnp.transpose(w, (2, 3, 1, 0)).reshape(kh * kw * C, O).astype(jnp.bfloat16)


def prepare_params(p, input_shape):
    """One-time conversion of PyTorch-layout parameters to kernel form."""
    C, H, W = input_shape
    oh1, ow1 = (H - 8) // 4 + 1, (W - 8) // 4 + 1
    oh2, ow2 = (oh1 - 4) // 2 + 1, (ow1 - 4) // 2 + 1

    def fc_cols_nhwc(w):
        # fc weight columns are indexed by NCHW flatten (c, h, w); permute them
        # to NHWC flatten order so `flat_nhwc @ W'.T == flat_nchw @ W.T`.
        return (w.reshape(256, 32, oh2, ow2)
                 .transpose(0, 2, 3, 1)
                 .reshape(256, oh2 * ow2 * 32))

    A = p["adv_w"].shape[0]
    w1 = jnp.concatenate([fc_cols_nhwc(p["fc_adv_w"]).T,
                          fc_cols_nhwc(p["fc_val_w"]).T], axis=1)    # (conv_out, 512)
    b1 = jnp.concatenate([p["fc_adv_b"], p["fc_val_b"]])             # (512,)
    w2 = jnp.zeros((512, A + 1), jnp.float32)
    w2 = w2.at[:256, :A].set(p["adv_w"].T)                           # adv uses hidden[:, :256]
    w2 = w2.at[256:, A:].set(p["val_w"].T)                           # val uses hidden[:, 256:]
    b2 = jnp.concatenate([p["adv_b"], p["val_b"]])                   # (A+1,)

    return {
        "conv1_w": _conv_w2d(p["conv1_w"]),
        "conv1_w_u8": _conv_w2d(p["conv1_w"] / 255.0),   # /255 folded for uint8 inputs
        "conv1_b": p["conv1_b"].astype(jnp.float32),
        "conv2_w": _conv_w2d(p["conv2_w"]),
        "conv2_b": p["conv2_b"].astype(jnp.float32),
        "head_w1": w1.astype(jnp.bfloat16),
        "head_b1": b1.astype(jnp.float32),
        "head_w2": w2.astype(jnp.bfloat16),
        "head_b2": b2.astype(jnp.float32),
    }


# ---------------------------------------------------------------------------
# QNetwork forward (use_noisy=False path; eval semantics == plain Linear)
# ---------------------------------------------------------------------------
def qnetwork_forward(kp, x):
    """Dueling-DQN forward. x: (B, C, H, W) uint8 or float (PyTorch interface)."""
    if x.ndim == 3:                                  # module's 3-D fallback
        x = x[None]
    if x.dtype == jnp.uint8:
        conv1_w = kp["conv1_w_u8"]                   # /255 folded into conv1 weights
    else:
        conv1_w = kp["conv1_w"]
    x = x.astype(jnp.bfloat16)
    x = jnp.transpose(x, (0, 2, 3, 1))               # single NCHW->NHWC at the input
    x = conv2d_relu_nhwc(x, conv1_w, kp["conv1_b"], kh=8, kw=8, stride=4)
    x = conv2d_relu_nhwc(x, kp["conv2_w"], kp["conv2_b"], kh=4, kw=4, stride=2)
    B = x.shape[0]
    flat = x.reshape(B, -1)                          # NHWC flatten; fc cols pre-permuted
    return pallas_dueling_head(flat, kp["head_w1"], kp["head_b1"],
                               kp["head_w2"], kp["head_b2"])
# TODO(synk): NoisyLinear (use_noisy=True) training-time noise sampling is not
# implemented; with use_noisy=False the forward is identical to nn.Linear.


# ---------------------------------------------------------------------------
# Deterministic parameter init (matches the shapes from QNetwork.__init__)
# ---------------------------------------------------------------------------
def init_params(key, channels, num_actions, conv_out_size):
    def u(k, shape, fan_in):
        bound = 1.0 / (fan_in ** 0.5)
        return jax.random.uniform(k, shape, jnp.float32, -bound, bound)

    ks = jax.random.split(key, 12)
    return {
        "conv1_w": u(ks[0], (16, channels, 8, 8), channels * 8 * 8),
        "conv1_b": u(ks[1], (16,), channels * 8 * 8),
        "conv2_w": u(ks[2], (32, 16, 4, 4), 16 * 4 * 4),
        "conv2_b": u(ks[3], (32,), 16 * 4 * 4),
        "fc_adv_w": u(ks[4], (256, conv_out_size), conv_out_size),
        "fc_adv_b": u(ks[5], (256,), conv_out_size),
        "fc_val_w": u(ks[6], (256, conv_out_size), conv_out_size),
        "fc_val_b": u(ks[7], (256,), conv_out_size),
        "adv_w": u(ks[8], (num_actions, 256), 256),
        "adv_b": u(ks[9], (num_actions,), 256),
        "val_w": u(ks[10], (1, 256), 256),
        "val_b": u(ks[11], (1,), 256),
    }


if __name__ == "__main__":
    # Small shapes consistent with the module:
    #   input_shape = (C=4, H=32, W=32), num_actions = 6, batch = 2.
    #   conv1: (32-8)//4+1 = 7 ; conv2: (7-4)//2+1 = 2 ; conv_out = 32*2*2 = 128
    B, C, H, W = 2, 4, 32, 32
    num_actions = 6
    conv_out_size = 32 * 2 * 2

    key = jax.random.PRNGKey(0)
    k_params, k_x = jax.random.split(key)
    params = init_params(k_params, C, num_actions, conv_out_size)
    kparams = prepare_params(params, (C, H, W))      # one-time weight repack/fuse

    # uint8 input exercises the x.float()/255 path (folded into conv1 weights).
    x = jax.random.randint(k_x, (B, C, H, W), 0, 256, dtype=jnp.int32).astype(jnp.uint8)

    q = jax.jit(qnetwork_forward)(kparams, x)
    q = jax.block_until_ready(q)
    assert q.shape == (B, num_actions) and q.dtype == jnp.float32
    print("KERNEL_OK")
</pallas_src>

<mosaic_0001>
module attributes {stable_mosaic.version = 11 : i64} {
  func.func @_matmul_bias_act_kernel(%arg0: i32, %arg1: memref<112x256xbf16, #tpu.memory_space<vmem>>, %arg2: memref<256x16xbf16, #tpu.memory_space<vmem>>, %arg3: memref<1x16xf32, #tpu.memory_space<vmem>>, %arg4: memref<112x16xbf16, #tpu.memory_space<vmem>>) attributes {dimension_semantics = [#tpu.dimension_semantics<parallel>], iteration_bounds = array<i64: 1>, scalar_prefetch = 0 : i64, scratch_operands = 0 : i64, tpu.core_type = #tpu.core_type<tc>, window_params = [{transform_indices = @transform_0, window_bounds = array<i64: 112, 256>}, {pipeline_mode = #tpu.pipeline_mode<synchronous>, transform_indices = @transform_1, window_bounds = array<i64: 256, 16>}, {pipeline_mode = #tpu.pipeline_mode<synchronous>, transform_indices = @transform_2, window_bounds = array<i64: 1, 16>}, {transform_indices = @transform_3, window_bounds = array<i64: 112, 16>}]} {
    %c0 = arith.constant 0 : index
    %c0_0 = arith.constant 0 : index
    %0 = vector.load %arg1[%c0, %c0_0] : memref<112x256xbf16, #tpu.memory_space<vmem>>, vector<112x256xbf16>
    %c0_1 = arith.constant 0 : index
    %c0_2 = arith.constant 0 : index
    %1 = vector.load %arg2[%c0_1, %c0_2] : memref<256x16xbf16, #tpu.memory_space<vmem>>, vector<256x16xbf16>
    %cst = arith.constant dense<0.000000e+00> : vector<112x16xf32>
    %2 = tpu.matmul %0, %1, %cst {dimension_numbers = #tpu.dot_dimension_numbers<[1], [0], [0], [1], [0, 0, 1, 1], [], []>} : vector<112x256xbf16>, vector<256x16xbf16>, vector<112x16xf32> -> vector<112x16xf32>
    %c0_3 = arith.constant 0 : index
    %c0_4 = arith.constant 0 : index
    %3 = vector.load %arg3[%c0_3, %c0_4] : memref<1x16xf32, #tpu.memory_space<vmem>>, vector<1x16xf32>
    %4 = vector.broadcast %3 : vector<1x16xf32> to vector<112x16xf32>
    %5 = arith.addf %2, %4 : vector<112x16xf32>
    %cst_5 = arith.constant 0.000000e+00 : f32
    %6 = vector.broadcast %cst_5 : f32 to vector<112x16xf32>
    %7 = arith.maximumf %5, %6 : vector<112x16xf32>
    %8 = arith.truncf %7 : vector<112x16xf32> to vector<112x16xbf16>
    %c0_6 = arith.constant 0 : index
    %c0_7 = arith.constant 0 : index
    %9 = vector.load %arg4[%c0_6, %c0_7] : memref<112x16xbf16, #tpu.memory_space<vmem>>, vector<112x16xbf16>
    tpu.vector_store %arg4[%c0_6, %c0_7], %8 {strides = array<i32>} : memref<112x16xbf16, #tpu.memory_space<vmem>>, vector<112x16xbf16>,
    return
  }
  func.func @transform_0(%arg0: i32) -> (i32, i32) {
    %c0_i32 = arith.constant 0 : i32
    %c0_i32_0 = arith.constant 0 : i32
    return %arg0, %c0_i32 : i32, i32
  }
  func.func @transform_1(%arg0: i32) -> (i32, i32) {
    %c0_i32 = arith.constant 0 : i32
    %c0_i32_0 = arith.constant 0 : i32
    %c0_i32_1 = arith.constant 0 : i32
    return %c0_i32, %c0_i32_0 : i32, i32
  }
  func.func @transform_2(%arg0: i32) -> (i32, i32) {
    %c0_i32 = arith.constant 0 : i32
    %c0_i32_0 = arith.constant 0 : i32
    %c0_i32_1 = arith.constant 0 : i32
    return %c0_i32, %c0_i32_0 : i32, i32
  }
  func.func @transform_3(%arg0: i32) -> (i32, i32) {
    %c0_i32 = arith.constant 0 : i32
    %c0_i32_0 = arith.constant 0 : i32
    return %arg0, %c0_i32 : i32, i32
  }
}

module attributes {stable_mosaic.version = 11 : i64} {
  func.func @_matmul_bias_act_kernel(%arg0: i32, %arg1: memref<16x256xbf16, #tpu.memory_space<vmem>>, %arg2: memref<256x32xbf16, #tpu.memory_space<vmem>>, %arg3: memref<1x32xf32, #tpu.memory_space<vmem>>, %arg4: memref<16x32xbf16, #tpu.memory_space<vmem>>) attributes {dimension_semantics = [#tpu.dimension_semantics<parallel>], iteration_bounds = array<i64: 1>, scalar_prefetch = 0 : i64, scratch_operands = 0 : i64, tpu.core_type = #tpu.core_type<tc>, window_params = [{transform_indices = @transform_0, window_bounds = array<i64: 16, 256>}, {pipeline_mode = #tpu.pipeline_mode<synchronous>, transform_indices = @transform_1, window_bounds = array<i64: 256, 32>}, {pipeline_mode = #tpu.pipeline_mode<synchronous>, transform_indices = @transform_2, window_bounds = array<i64: 1, 32>}, {transform_indices = @transform_3, window_bounds = array<i64: 16, 32>}]} {
    %c0 = arith.constant 0 : index
    %c0_0 = arith.constant 0 : index
    %0 = vector.load %arg1[%c0, %c0_0] : memref<16x256xbf16, #tpu.memory_space<vmem>>, vector<16x256xbf16>
    %c0_1 = arith.constant 0 : index
    %c0_2 = arith.constant 0 : index
    %1 = vector.load %arg2[%c0_1, %c0_2] : memref<256x32xbf16, #tpu.memory_space<vmem>>, vector<256x32xbf16>
    %cst = arith.constant dense<0.000000e+00> : vector<16x32xf32>
    %2 = tpu.matmul %0, %1, %cst {dimension_numbers = #tpu.dot_dimension_numbers<[1], [0], [0], [1], [0, 0, 1, 1], [], []>} : vector<16x256xbf16>, vector<256x32xbf16>, vector<16x32xf32> -> vector<16x32xf32>
    %c0_3 = arith.constant 0 : index
    %c0_4 = arith.constant 0 : index
    %3 = vector.load %arg3[%c0_3, %c0_4] : memref<1x32xf32, #tpu.memory_space<vmem>>, vector<1x32xf32>
    %4 = vector.broadcast %3 : vector<1x32xf32> to vector<16x32xf32>
    %5 = arith.addf %2, %4 : vector<16x32xf32>
    %cst_5 = arith.constant 0.000000e+00 : f32
    %6 = vector.broadcast %cst_5 : f32 to vector<16x32xf32>
    %7 = arith.maximumf %5, %6 : vector<16x32xf32>
    %8 = arith.truncf %7 : vector<16x32xf32> to vector<16x32xbf16>
    %c0_6 = arith.constant 0 : index
    %c0_7 = arith.constant 0 : index
    %9 = vector.load %arg4[%c0_6, %c0_7] : memref<16x32xbf16, #tpu.memory_space<vmem>>, vector<16x32xbf16>
    tpu.vector_store %arg4[%c0_6, %c0_7], %8 {strides = array<i32>} : memref<16x32xbf16, #tpu.memory_space<vmem>>, vector<16x32xbf16>,
    return
  }
  func.func @transform_0(%arg0: i32) -> (i32, i32) {
    %c0_i32 = arith.constant 0 : i32
    %c0_i32_0 = arith.constant 0 : i32
    return %arg0, %c0_i32 : i32, i32
  }
  func.func @transform_1(%arg0: i32) -> (i32, i32) {
    %c0_i32 = arith.constant 0 : i32
    %c0_i32_0 = arith.constant 0 : i32
    %c0_i32_1 = arith.constant 0 : i32
    return %c0_i32, %c0_i32_0 : i32, i32
  }
  func.func @transform_2(%arg0: i32) -> (i32, i32) {
    %c0_i32 = arith.constant 0 : i32
    %c0_i32_0 = arith.constant 0 : i32
    %c0_i32_1 = arith.constant 0 : i32
    return %c0_i32, %c0_i32_0 : i32, i32
  }
  func.func @transform_3(%arg0: i32) -> (i32, i32) {
    %c0_i32 = arith.constant 0 : i32
    %c0_i32_0 = arith.constant 0 : i32
    return %arg0, %c0_i32 : i32, i32
  }
}

module attributes {stable_mosaic.version = 11 : i64} {
  func.func @_dueling_head_kernel(%arg0: i32, %arg1: memref<16x128xbf16, #tpu.memory_space<vmem>>, %arg2: memref<128x512xbf16, #tpu.memory_space<vmem>>, %arg3: memref<1x512xf32, #tpu.memory_space<vmem>>, %arg4: memref<512x7xbf16, #tpu.memory_space<vmem>>, %arg5: memref<1x7xf32, #tpu.memory_space<vmem>>, %arg6: memref<16x6xf32, #tpu.memory_space<vmem>>) attributes {dimension_semantics = [#tpu.dimension_semantics<parallel>], iteration_bounds = array<i64: 1>, scalar_prefetch = 0 : i64, scratch_operands = 0 : i64, tpu.core_type = #tpu.core_type<tc>, window_params = [{transform_indices = @transform_0, window_bounds = array<i64: 16, 128>}, {pipeline_mode = #tpu.pipeline_mode<synchronous>, transform_indices = @transform_1, window_bounds = array<i64: 128, 512>}, {pipeline_mode = #tpu.pipeline_mode<synchronous>, transform_indices = @transform_2, window_bounds = array<i64: 1, 512>}, {pipeline_mode = #tpu.pipeline_mode<synchronous>, transform_indices = @transform_3, window_bounds = array<i64: 512, 7>}, {pipeline_mode = #tpu.pipeline_mode<synchronous>, transform_indices = @transform_4, window_bounds = array<i64: 1, 7>}, {transform_indices = @transform_5, window_bounds = array<i64: 16, 6>}]} {
    %c0 = arith.constant 0 : index
    %c0_0 = arith.constant 0 : index
    %0 = vector.load %arg1[%c0, %c0_0] : memref<16x128xbf16, #tpu.memory_space<vmem>>, vector<16x128xbf16>
    %c0_1 = arith.constant 0 : index
    %c0_2 = arith.constant 0 : index
    %1 = vector.load %arg2[%c0_1, %c0_2] : memref<128x512xbf16, #tpu.memory_space<vmem>>, vector<128x512xbf16>
    %cst = arith.constant dense<0.000000e+00> : vector<16x512xf32>
    %2 = tpu.matmul %0, %1, %cst {dimension_numbers = #tpu.dot_dimension_numbers<[1], [0], [0], [1], [0, 0, 1, 1], [], []>} : vector<16x128xbf16>, vector<128x512xbf16>, vector<16x512xf32> -> vector<16x512xf32>
    %c0_3 = arith.constant 0 : index
    %c0_4 = arith.constant 0 : index
    %3 = vector.load %arg3[%c0_3, %c0_4] : memref<1x512xf32, #tpu.memory_space<vmem>>, vector<1x512xf32>
    %4 = vector.broadcast %3 : vector<1x512xf32> to vector<16x512xf32>
    %5 = arith.addf %2, %4 : vector<16x512xf32>
    %cst_5 = arith.constant 0.000000e+00 : f32
    %6 = vector.broadcast %cst_5 : f32 to vector<16x512xf32>
    %7 = arith.maximumf %5, %6 : vector<16x512xf32>
    %8 = arith.truncf %7 : vector<16x512xf32> to vector<16x512xbf16>
    %c0_6 = arith.constant 0 : index
    %c0_7 = arith.constant 0 : index
    %9 = vector.load %arg4[%c0_6, %c0_7] : memref<512x7xbf16, #tpu.memory_space<vmem>>, vector<512x7xbf16>
    %cst_8 = arith.constant dense<0.000000e+00> : vector<16x7xf32>
    %10 = tpu.matmul %8, %9, %cst_8 {dimension_numbers = #tpu.dot_dimension_numbers<[1], [0], [0], [1], [0, 0, 1, 1], [], []>} : vector<16x512xbf16>, vector<512x7xbf16>, vector<16x7xf32> -> vector<16x7xf32>
    %c0_9 = arith.constant 0 : index
    %c0_10 = arith.constant 0 : index
    %11 = vector.load %arg5[%c0_9, %c0_10] : memref<1x7xf32, #tpu.memory_space<vmem>>, vector<1x7xf32>
    %12 = vector.broadcast %11 : vector<1x7xf32> to vector<16x7xf32>
    %13 = arith.addf %10, %12 : vector<16x7xf32>
    %14 = vector.extract_strided_slice %13 {offsets = [0, 0], sizes = [16, 6], strides = [1, 1]} : vector<16x7xf32> to vector<16x6xf32>
    %15 = vector.extract_strided_slice %13 {offsets = [0, 6], sizes = [16, 1], strides = [1, 1]} : vector<16x7xf32> to vector<16x1xf32>
    %cst_11 = arith.constant dense<0.000000e+00> : vector<16xf32>
    %16 = vector.multi_reduction <add>, %14, %cst_11 [1] : vector<16x6xf32> to vector<16xf32>
    %17 = vector.shape_cast %16 : vector<16xf32> to vector<16x1xf32>
    %cst_12 = arith.constant 6.000000e+00 : f32
    %18 = vector.broadcast %cst_12 : f32 to vector<16x1xf32>
    %19 = arith.divf %17, %18 : vector<16x1xf32>
    %20 = vector.broadcast %19 : vector<16x1xf32> to vector<16x6xf32>
    %21 = arith.subf %14, %20 : vector<16x6xf32>
    %22 = vector.broadcast %15 : vector<16x1xf32> to vector<16x6xf32>
    %23 = arith.addf %22, %21 : vector<16x6xf32>
    %c0_13 = arith.constant 0 : index
    %c0_14 = arith.constant 0 : index
    %24 = vector.load %arg6[%c0_13, %c0_14] : memref<16x6xf32, #tpu.memory_space<vmem>>, vector<16x6xf32>
    tpu.vector_store %arg6[%c0_13, %c0_14], %23 {strides = array<i32>} : memref<16x6xf32, #tpu.memory_space<vmem>>, vector<16x6xf32>,
    return
  }
  func.func @transform_0(%arg0: i32) -> (i32, i32) {
    %c0_i32 = arith.constant 0 : i32
    %c0_i32_0 = arith.constant 0 : i32
    return %arg0, %c0_i32 : i32, i32
  }
  func.func @transform_1(%arg0: i32) -> (i32, i32) {
    %c0_i32 = arith.constant 0 : i32
    %c0_i32_0 = arith.constant 0 : i32
    %c0_i32_1 = arith.constant 0 : i32
    return %c0_i32, %c0_i32_0 : i32, i32
  }
  func.func @transform_2(%arg0: i32) -> (i32, i32) {
    %c0_i32 = arith.constant 0 : i32
    %c0_i32_0 = arith.constant 0 : i32
    %c0_i32_1 = arith.constant 0 : i32
    return %c0_i32, %c0_i32_0 : i32, i32
  }
  func.func @transform_3(%arg0: i32) -> (i32, i32) {
    %c0_i32 = arith.constant 0 : i32
    %c0_i32_0 = arith.constant 0 : i32
    %c0_i32_1 = arith.constant 0 : i32
    return %c0_i32, %c0_i32_0 : i32, i32
  }
  func.func @transform_4(%arg0: i32) -> (i32, i32) {
    %c0_i32 = arith.constant 0 : i32
    %c0_i32_0 = arith.constant 0 : i32
    %c0_i32_1 = arith.constant 0 : i32
    return %c0_i32, %c0_i32_0 : i32, i32
  }
  func.func @transform_5(%arg0: i32) -> (i32, i32) {
    %c0_i32 = arith.constant 0 : i32
    %c0_i32_0 = arith.constant 0 : i32
    return %arg0, %c0_i32 : i32, i32
  }
}

</mosaic_0001>

<bundles_post_ra>
// kernel: qnetwork_forward.3
= control target key start
LH: loop header
LB: loop body
LE: loop exit
PB: predicated region body
PF: predicated region fallthrough
CT: control target
= control target key end

     0   :  { %vm393_vm0 = vcmask 125952   ;;  %s767_s1 = inlined_call_operand.vmem [shape: bf16[256,16], index: 1, kind: input, shape index: {}]   ;;  %s768_s0 = inlined_call_operand.vmem [shape: bf16[112,256], index: 0, kind: input, shape index: {}]   ;;  %s769_s2 = inlined_call_operand.vmem [shape: f32[1,16], index: 2, kind: input, shape index: {}]   ;;  %s770_s3 = inlined_call_operand.vmem [shape: bf16[112,16], index: 3, kind: output, shape index: {}]  }
   0x1   :  { %v545_v0 = vld [vmem:[%s767_s1 + $0x40] sm:$0xff]   ;;  %v547_v2 = vld [vmem:[%s767_s1 + $0x48] sm:$0xff]   ;;  %v549_v4 = vld [vmem:[%s767_s1 + $0x50] sm:$0xff]  }
   0x2   :  { %v546_v1 = vld [vmem:[%s767_s1] sm:$0xff]   ;;  %471 = vmatprep.subr.bf16.mxu0 %v545_v0  ;;  %529 = vmatprep.subr.bf16.mxu1 %v545_v0  ;;  %v548_v3 = vld [vmem:[%s767_s1 + $0x8] sm:$0xff]   ;;  %v550_v5 = vld [vmem:[%s767_s1 + $0x10] sm:$0xff]  }
   0x3   :  { %472 = vmatpush3.bf16.msra.mxu0 %v546_v1  ;;  %537 = vmatpush3.bf16.msra.mxu1 %v546_v1  ;;  %v551_v6 = vld [vmem:[%s767_s1 + $0x58] sm:$0xff]   ;;  %v553_v8 = vld [vmem:[%s767_s1 + $0x60] sm:$0xff]   ;;  %v555_v10 = vld [vmem:[%s767_s1 + $0x68] sm:$0xff]  }
   0x4   :  { %473 = vmatprep.subr.bf16.mxu0 %v547_v2  ;;  %530 = vmatprep.subr.bf16.mxu1 %v547_v2  ;;  %v552_v7 = vld [vmem:[%s767_s1 + $0x18] sm:$0xff]   ;;  %v554_v9 = vld [vmem:[%s767_s1 + $0x20] sm:$0xff]   ;;  %v556_v13 = vld [vmem:[%s767_s1 + $0x28] sm:$0xff]  }
   0x5   :  { %v563_v11 = vld [vmem:[%s768_s0 + $0x4] ss:$8 sps:$4 sm:$0xff]   ;;  %v557_v14 = vld [vmem:[%s767_s1 + $0x70] sm:$0xff]   ;;  %v559_v16 = vld [vmem:[%s767_s1 + $0x78] sm:$0xff]  }
   0x6   :  { %v566_v12 = vld [vmem:[%s768_s0 + $0x44] ss:$8 sps:$4 sm:$0xff]   ;;  %266 = vmatprep.mubr.bf16.mxu0 %v563_v11  ;;  %v558_v15 = vld [vmem:[%s767_s1 + $0x30] sm:$0xff]   ;;  %v560_v17 = vld [vmem:[%s767_s1 + $0x38] sm:$0xff]  }
   0x7   :  { %474 = vmatpush3.bf16.msra.mxu0 %v548_v3  ;;  %538 = vmatpush3.bf16.msra.mxu1 %v548_v3  ;;  %v561_v18 = vld [vmem:[%s768_s0] ss:$8 sps:$4 sm:$0xff]   ;;  %v567_v20 = vld [vmem:[%s768_s0 + $0x14] ss:$8 sps:$4 sm:$0xff]   ;;  %v569_v22 = vld [vmem:[%s768_s0 + $0x10] ss:$8 sps:$4 sm:$0xff]  }
   0x8   :  { %475 = vmatprep.subr.bf16.mxu0 %v549_v4  ;;  %531 = vmatprep.subr.bf16.mxu1 %v549_v4  ;;  %v564_v19 = vld [vmem:[%s768_s0 + $0x40] ss:$8 sps:$4 sm:$0xff]   ;;  %v570_v21 = vld [vmem:[%s768_s0 + $0x54] ss:$8 sps:$4 sm:$0xff]   ;;  %v572_v23 = vld [vmem:[%s768_s0 + $0x50] ss:$8 sps:$4 sm:$0xff]  }
   0x9   :  { %298 = vmatprep.mubr.bf16.mxu1 %v566_v12  ;;  %v573_v24 = vld [vmem:[%s768_s0 + $0x24] ss:$8 sps:$4 sm:$0xff]   ;;  %v575_v26 = vld [vmem:[%s768_s0 + $0x20] ss:$8 sps:$4 sm:$0xff]   ;;  %v579_v28 = vld [vmem:[%s768_s0 + $0x34] ss:$8 sps:$4 sm:$0xff]  }
   0xa   :  { %v576_v25 = vld [vmem:[%s768_s0 + $0x64] ss:$8 sps:$4 sm:$0xff]   ;;  %v578_v27 = vld [vmem:[%s768_s0 + $0x60] ss:$8 sps:$4 sm:$0xff]   ;;  %v581_v29 = vld [vmem:[%s768_s0 + $0x30] ss:$8 sps:$4 sm:$0xff]  }
   0xb   :  { %476 = vmatpush3.bf16.msra.mxu0 %v550_v5  ;;  %539 = vmatpush3.bf16.msra.mxu1 %v550_v5  ;;  %v695_v32 = vld [vmem:[%s769_s2] ss:$0 sm:$0xff] }
   0xc   :  { %477 = vmatprep.subr.bf16.mxu0 %v551_v6  ;;  %532 = vmatprep.subr.bf16.mxu1 %v551_v6 }
   0xf   :  { %478 = vmatpush3.bf16.msra.mxu0 %v552_v7  ;;  %540 = vmatpush3.bf16.msra.mxu1 %v552_v7 }
  0x10   :  { %479 = vmatprep.subr.bf16.mxu0 %v553_v8  ;;  %533 = vmatprep.subr.bf16.mxu1 %v553_v8 }
  0x13   :  { %480 = vmatpush3.bf16.msra.mxu0 %v554_v9  ;;  %541 = vmatpush3.bf16.msra.mxu1 %v554_v9 }
  0x14   :  { %481 = vmatprep.subr.bf16.mxu0 %v555_v10  ;;  %534 = vmatprep.subr.bf16.mxu1 %v555_v10 }
  0x17   :  { %482 = vmatpush3.bf16.msra.mxu0 %v556_v13  ;;  %542 = vmatpush3.bf16.msra.mxu1 %v556_v13 }
  0x18   :  { %483 = vmatprep.subr.bf16.mxu0 %v557_v14  ;;  %535 = vmatprep.subr.bf16.mxu1 %v557_v14 }
  0x1b   :  { %484 = vmatpush3.bf16.msra.mxu0 %v558_v15  ;;  %543 = vmatpush3.bf16.msra.mxu1 %v558_v15 }
  0x1c   :  { %485 = vmatprep.subr.bf16.mxu0 %v559_v16  ;;  %536 = vmatprep.subr.bf16.mxu1 %v559_v16 }
  0x1f   :  { %486 = vmatpush3.bf16.msra.mxu0 %v560_v17  ;;  %544 = vmatpush3.bf16.msra.mxu1 %v560_v17 }
  0x22   :  { %267 = vmatmul.mubr.bf16.vlgmr.msra.gmra.mrb[0].mxu0 %v561_v18  ;;  %299 = vmatmul.mubr.bf16.vlgmr.msra.gmra.mrb[0].mxu1 %v564_v19 }
  0x23   :  { %274 = vmatprep.mubr.bf16.mxu0 %v567_v20  ;;  %306 = vmatprep.mubr.bf16.mxu1 %v570_v21 }
  0x2a   :  { %275 = vmatmul.mubr.bf16.gmra.mrb[4].mxu0 %v569_v22  ;;  %307 = vmatmul.mubr.bf16.gmra.mrb[4].mxu1 %v572_v23 }
  0x2b   :  { %282 = vmatprep.mubr.bf16.mxu0 %v573_v24  ;;  %314 = vmatprep.mubr.bf16.mxu1 %v576_v25 }
  0x32   :  { %283 = vmatmul.mubr.bf16.gmra.mrb[8].mxu0 %v575_v26  ;;  %315 = vmatmul.mubr.bf16.gmra.mrb[8].mxu1 %v578_v27 }
  0x33   :  { %290 = vmatprep.mubr.bf16.mxu0 %v579_v28 }
  0x3a   :  { %291 = vmatmul.mubr.bf16.gmra.mrb[12].mxu0 %v581_v29 }
  0xf5   :  { %v487_v30 = vpop.f32.mrb[0].mxu0  ;;  %v511_v31 = vpop.f32.mrb[0].mxu1 }
  0xf6   :  { %v488_v33 = vpop.f32.mrb[1].mxu0  ;;  %v512_v34 = vpop.f32.mrb[1].mxu1 }
  0xf7   :  { %v489_v35 = vadd.f32 %v488_v33, %v487_v30  ;;  %v490_v36 = vpop.f32.mrb[2].mxu0  ;;  %v513_v37 = vadd.f32 %v512_v34, %v511_v31  ;;  %v514_v38 = vpop.f32.mrb[2].mxu1 }
  0xf8   :  { %v491_v39 = vpop.f32.mrb[3].mxu0  ;;  %v515_v40 = vpop.f32.mrb[3].mxu1 }
  0xf9   :  { %v269_v41 = vadd.f32 %v489_v35, %v695_v32  ;;  %v492_v42 = vadd.f32 %v491_v39, %v490_v36  ;;  %v301_v43 = vadd.f32 %v513_v37, %v695_v32  ;;  %v516_v44 = vadd.f32 %v515_v40, %v514_v38 }
  0xfb   :  { %v323_v45 = vmax.f32 %v269_v41, 0.0  ;;  %v272_v46 = vadd.f32 %v492_v42, %v695_v32  ;;  %v331_v47 = vmax.f32 %v301_v43, 0.0  ;;  %v304_v48 = vadd.f32 %v516_v44, %v695_v32 }
  0xfd   :  { %v457_v49 = vpack.c.bf16 %v323_v45, %v323_v45  ;;  %v324_v50 = vmax.f32 %v272_v46, 0.0  ;;  %v465_v51 = vpack.c.bf16 %v331_v47, %v331_v47  ;;  %v493_v52 = vpop.f32.mrb[4].mxu0  ;;  %v332_v53 = vmax.f32 %v304_v48, 0.0  ;;  %v517_v54 = vpop.f32.mrb[4].mxu1 }
  0xfe   :  { %v494_v55 = vpop.f32.mrb[5].mxu0  ;;  %v518_v56 = vpop.f32.mrb[5].mxu1 }
  0xff   :  { %394 = vst.msk [vmem:[%s770_s3] sm:$0xf] %vm393_vm0, %v457_v49  ;;  %v458_v57 = vpack.c.bf16 %v324_v50, %v324_v50  ;;  %402 = vst.msk [vmem:[%s770_s3 + $0x20] sm:$0xf] %vm393_vm0, %v465_v51  ;;  %v466_v58 = vpack.c.bf16 %v332_v53, %v332_v53  ;;  %v495_v59 = vadd.f32 %v494_v55, %v493_v52  ;;  %v496_v60 = vpop.f32.mrb[6].mxu0  ;;  %v520_v62 = vpop.f32.mrb[6].mxu1 }
 0x100   :  { %v519_v61 = vadd.f32 %v518_v56, %v517_v54  ;;  %v497_v63 = vpop.f32.mrb[7].mxu0  ;;  %v521_v0 = vpop.f32.mrb[7].mxu1 }
 0x101   :  { %395 = vst.msk [vmem:[%s770_s3 + $0x4] sm:$0xf] %vm393_vm0, %v458_v57  ;;  %403 = vst.msk [vmem:[%s770_s3 + $0x24] sm:$0xf] %vm393_vm0, %v466_v58  ;;  %v277_v1 = vadd.f32 %v495_v59, %v695_v32  ;;  %v498_v2 = vadd.f32 %v497_v63, %v496_v60  ;;  %v522_v4 = vadd.f32 %v521_v0, %v520_v62 }
 0x102   :  { %v309_v3 = vadd.f32 %v519_v61, %v695_v32 }
 0x103   :  { %v325_v5 = vmax.f32 %v277_v1, 0.0  ;;  %v280_v6 = vadd.f32 %v498_v2, %v695_v32  ;;  %v312_v8 = vadd.f32 %v522_v4, %v695_v32 }
 0x104   :  { %v333_v7 = vmax.f32 %v309_v3, 0.0 }
 0x105   :  { %v459_v9 = vpack.c.bf16 %v325_v5, %v325_v5  ;;  %v326_v10 = vmax.f32 %v280_v6, 0.0  ;;  %v499_v12 = vpop.f32.mrb[8].mxu0  ;;  %v334_v13 = vmax.f32 %v312_v8, 0.0  ;;  %v523_v14 = vpop.f32.mrb[8].mxu1 }
 0x106   :  { %v467_v11 = vpack.c.bf16 %v333_v7, %v333_v7  ;;  %v500_v15 = vpop.f32.mrb[9].mxu0  ;;  %v524_v16 = vpop.f32.mrb[9].mxu1 }
 0x107   :  { %396 = vst.msk [vmem:[%s770_s3 + $0x8] sm:$0xf] %vm393_vm0, %v459_v9  ;;  %v460_v17 = vpack.c.bf16 %v326_v10, %v326_v10  ;;  %v468_v18 = vpack.c.bf16 %v334_v13, %v334_v13  ;;  %v501_v19 = vadd.f32 %v500_v15, %v499_v12  ;;  %v502_v20 = vpop.f32.mrb[10].mxu0  ;;  %v525_v21 = vadd.f32 %v524_v16, %v523_v14  ;;  %v526_v22 = vpop.f32.mrb[10].mxu1 }
 0x108   :  { %404 = vst.msk [vmem:[%s770_s3 + $0x28] sm:$0xf] %vm393_vm0, %v467_v11  ;;  %v503_v23 = vpop.f32.mrb[11].mxu0  ;;  %v527_v24 = vpop.f32.mrb[11].mxu1 }
 0x109   :  { %397 = vst.msk [vmem:[%s770_s3 + $0xc] sm:$0xf] %vm393_vm0, %v460_v17  ;;  %405 = vst.msk [vmem:[%s770_s3 + $0x2c] sm:$0xf] %vm393_vm0, %v468_v18  ;;  %v285_v25 = vadd.f32 %v501_v19, %v695_v32  ;;  %v504_v26 = vadd.f32 %v503_v23, %v502_v20  ;;  %v317_v27 = vadd.f32 %v525_v21, %v695_v32 }
 0x10a   :  { %v528_v28 = vadd.f32 %v527_v24, %v526_v22 }
 0x10b   :  { %v327_v29 = vmax.f32 %v285_v25, 0.0  ;;  %v288_v30 = vadd.f32 %v504_v26, %v695_v32  ;;  %v335_v31 = vmax.f32 %v317_v27, 0.0 }
 0x10c   :  { %v320_v33 = vadd.f32 %v528_v28, %v695_v32 }
 0x10d   :  { %v461_v34 = vpack.c.bf16 %v327_v29, %v327_v29  ;;  %v328_v35 = vmax.f32 %v288_v30, 0.0  ;;  %v469_v36 = vpack.c.bf16 %v335_v31, %v335_v31  ;;  %v505_v37 = vpop.f32.mrb[12].mxu0 }
 0x10e   :  { %v336_v38 = vmax.f32 %v320_v33, 0.0  ;;  %v506_v39 = vpop.f32.mrb[13].mxu0 }
 0x10f   :  { %398 = vst.msk [vmem:[%s770_s3 + $0x10] sm:$0xf] %vm393_vm0, %v461_v34  ;;  %v462_v40 = vpack.c.bf16 %v328_v35, %v328_v35  ;;  %406 = vst.msk [vmem:[%s770_s3 + $0x30] sm:$0xf] %vm393_vm0, %v469_v36  ;;  %v507_v42 = vadd.f32 %v506_v39, %v505_v37  ;;  %v508_v43 = vpop.f32.mrb[14].mxu0 }
 0x110   :  { %v470_v41 = vpack.c.bf16 %v336_v38, %v336_v38  ;;  %v509_v44 = vpop.f32.mrb[15].mxu0 }
 0x111   :  { %399 = vst.msk [vmem:[%s770_s3 + $0x14] sm:$0xf] %vm393_vm0, %v462_v40  ;;  %v293_v45 = vadd.f32 %v507_v42, %v695_v32  ;;  %v510_v46 = vadd.f32 %v509_v44, %v508_v43 }
 0x112   :  { %407 = vst.msk [vmem:[%s770_s3 + $0x34] sm:$0xf] %vm393_vm0, %v470_v41 }
 0x113   :  { %v329_v47 = vmax.f32 %v293_v45, 0.0  ;;  %v296_v48 = vadd.f32 %v510_v46, %v695_v32 }
 0x115   :  { %v463_v49 = vpack.c.bf16 %v329_v47, %v329_v47  ;;  %v330_v50 = vmax.f32 %v296_v48, 0.0 }
 0x117   :  { %400 = vst.msk [vmem:[%s770_s3 + $0x18] sm:$0xf] %vm393_vm0, %v463_v49  ;;  %v464_v51 = vpack.c.bf16 %v330_v50, %v330_v50 }
 0x119   :  { %401 = vst.msk [vmem:[%s770_s3 + $0x1c] sm:$0xf] %vm393_vm0, %v464_v51 }

// kernel: qnetwork_forward.4
= control target key start
LH: loop header
LB: loop body
LE: loop exit
PB: predicated region body
PF: predicated region fallthrough
CT: control target
= control target key end

     0   :  { %vm213_vm0 = vcmask 257024   ;;  %s367_s1 = inlined_call_operand.vmem [shape: bf16[256,32], index: 1, kind: input, shape index: {}]   ;;  %s368_s0 = inlined_call_operand.vmem [shape: bf16[16,256], index: 0, kind: input, shape index: {}]   ;;  %s369_s2 = inlined_call_operand.vmem [shape: f32[1,32], index: 2, kind: input, shape index: {}]   ;;  %s370_s3 = inlined_call_operand.vmem [shape: bf16[16,32], index: 3, kind: output, shape index: {}]  }
   0x1   :  { %v265_v0 = vld [vmem:[%s367_s1 + $0x40] sm:$0xff]   ;;  %v267_v2 = vld [vmem:[%s367_s1 + $0x48] sm:$0xff]   ;;  %v269_v4 = vld [vmem:[%s367_s1 + $0x50] sm:$0xff]  }
   0x2   :  { %v266_v1 = vld [vmem:[%s367_s1] sm:$0xff]   ;;  %243 = vmatprep.subr.bf16.mxu0 %v265_v0  ;;  %v268_v3 = vld [vmem:[%s367_s1 + $0x8] sm:$0xff]   ;;  %v270_v5 = vld [vmem:[%s367_s1 + $0x10] sm:$0xff]  }
   0x3   :  { %244 = vmatpush3.bf16.msra.mxu0 %v266_v1  ;;  %v271_v6 = vld [vmem:[%s367_s1 + $0x58] sm:$0xff]   ;;  %v273_v8 = vld [vmem:[%s367_s1 + $0x60] sm:$0xff]   ;;  %v275_v10 = vld [vmem:[%s367_s1 + $0x68] sm:$0xff]  }
   0x4   :  { %245 = vmatprep.subr.bf16.mxu0 %v267_v2  ;;  %v272_v7 = vld [vmem:[%s367_s1 + $0x18] sm:$0xff]   ;;  %v274_v9 = vld [vmem:[%s367_s1 + $0x20] sm:$0xff]   ;;  %v276_v12 = vld [vmem:[%s367_s1 + $0x28] sm:$0xff]  }
   0x5   :  { %v283_v11 = vld [vmem:[%s368_s0 + $0x4] ss:$8 sps:$4 sm:$0xff]   ;;  %v277_v13 = vld [vmem:[%s367_s1 + $0x70] sm:$0xff]   ;;  %v279_v15 = vld [vmem:[%s367_s1 + $0x78] sm:$0xff]  }
   0x6   :  { %194 = vmatprep.mubr.bf16.mxu0 %v283_v11  ;;  %v278_v14 = vld [vmem:[%s367_s1 + $0x30] sm:$0xff]   ;;  %v280_v16 = vld [vmem:[%s367_s1 + $0x38] sm:$0xff]   ;;  %v281_v17 = vld [vmem:[%s368_s0] ss:$8 sps:$4 sm:$0xff]  }
   0x7   :  { %246 = vmatpush3.bf16.msra.mxu0 %v268_v3  ;;  %v220_v19 = vld [vmem:[%s369_s2] ss:$0 sm:$0xff] }
   0x8   :  { %247 = vmatprep.subr.bf16.mxu0 %v269_v4 }
   0xb   :  { %248 = vmatpush3.bf16.msra.mxu0 %v270_v5 }
   0xc   :  { %249 = vmatprep.subr.bf16.mxu0 %v271_v6 }
   0xf   :  { %250 = vmatpush3.bf16.msra.mxu0 %v272_v7 }
  0x10   :  { %251 = vmatprep.subr.bf16.mxu0 %v273_v8 }
  0x13   :  { %252 = vmatpush3.bf16.msra.mxu0 %v274_v9 }
  0x14   :  { %253 = vmatprep.subr.bf16.mxu0 %v275_v10 }
  0x17   :  { %254 = vmatpush3.bf16.msra.mxu0 %v276_v12 }
  0x18   :  { %255 = vmatprep.subr.bf16.mxu0 %v277_v13 }
  0x1b   :  { %256 = vmatpush3.bf16.msra.mxu0 %v278_v14 }
  0x1c   :  { %257 = vmatprep.subr.bf16.mxu0 %v279_v15 }
  0x1f   :  { %258 = vmatpush3.bf16.msra.mxu0 %v280_v16 }
  0x22   :  { %195 = vmatmul.mubr.bf16.vlgmr.msra.gmra.mrb[0].mxu0 %v281_v17 }
  0xf5   :  { %v259_v18 = vpop.f32.mrb[0].mxu0 }
  0xf6   :  { %v260_v20 = vpop.f32.mrb[1].mxu0 }
  0xf7   :  { %v261_v21 = vadd.f32 %v260_v20, %v259_v18  ;;  %v262_v22 = vpop.f32.mrb[2].mxu0 }
  0xf8   :  { %v263_v23 = vpop.f32.mrb[3].mxu0 }
  0xf9   :  { %v197_v24 = vadd.f32 %v261_v21, %v220_v19  ;;  %v264_v25 = vadd.f32 %v263_v23, %v262_v22 }
  0xfb   :  { %v203_v26 = vmax.f32 %v197_v24, 0.0  ;;  %v200_v27 = vadd.f32 %v264_v25, %v220_v19 }
  0xfd   :  { %v241_v28 = vpack.c.bf16 %v203_v26, %v203_v26  ;;  %v204_v29 = vmax.f32 %v200_v27, 0.0 }
  0xff   :  { %214 = vst.msk [vmem:[%s370_s3] sm:$0xf] %vm213_vm0, %v241_v28  ;;  %v242_v30 = vpack.c.bf16 %v204_v29, %v204_v29 }
 0x101   :  { %215 = vst.msk [vmem:[%s370_s3 + $0x4] sm:$0xf] %vm213_vm0, %v242_v30 }

// kernel: qnetwork_forward.5
= control target key start
LH: loop header
LB: loop body
LE: loop exit
PB: predicated region body
PF: predicated region fallthrough
CT: control target
= control target key end

     0   :  { %v911_v1 = vmov 0   ;;  %vm686_vm0 = vcmask 48128   ;;  %s1154_s1 = inlined_call_operand.vmem [shape: bf16[128,512], index: 1, kind: input, shape index: {}]   ;;  %s1155_s0 = inlined_call_operand.vmem [shape: bf16[16,128], index: 0, kind: input, shape index: {}]   ;;  %s1156_s3 = inlined_call_operand.vmem [shape: bf16[512,7], index: 3, kind: input, shape index: {}]   ;;  %s1157_s2 = inlined_call_operand.vmem [shape: f32[1,512], index: 2, kind: input, shape index: {}]   ;;  %s1158_s4 = inlined_call_operand.vmem [shape: f32[1,7], index: 4, kind: input, shape index: {}]   ;;  %s1159_s5 = inlined_call_operand.vmem [shape: f32[16,6], index: 5, kind: output, shape index: {}]  }
   0x1   :  { %v830_v0 = vld [vmem:[%s1154_s1 + $0x4] ss:$16 sps:$4 sm:$0xff]   ;;  %275 = vmatprep.mubr.bf16.mxu0 %v911_v1  ;;  %318 = vmatprep.mubr.bf16.mxu1 %v911_v1  ;;  %v832_v2 = vld [vmem:[%s1154_s1 + $0xc] ss:$16 sps:$4 sm:$0xff]   ;;  %v834_v3 = vld [vmem:[%s1154_s1] ss:$16 sps:$4 sm:$0xff]  }
   0x2   :  { %243 = vmatprep.subr.bf16.mxu0 %v830_v0  ;;  %v835_v4 = vld [vmem:[%s1154_s1 + $0x8] ss:$16 sps:$4 sm:$0xff]   ;;  %286 = vmatprep.subr.bf16.mxu1 %v832_v2  ;;  %v836_v5 = vld [vmem:[%s1154_s1 + $0x24] ss:$16 sps:$4 sm:$0xff]   ;;  %v838_v6 = vld [vmem:[%s1154_s1 + $0x2c] ss:$16 sps:$4 sm:$0xff]   ;;  %v57_v2 = vlaneseq }
   0x3   :  { %244 = vmatpush1.bf16.msra.mxu0 %v834_v3  ;;  %287 = vmatpush1.bf16.msra.mxu1 %v835_v4  ;;  %v840_v7 = vld [vmem:[%s1154_s1 + $0x20] ss:$16 sps:$4 sm:$0xff]   ;;  %v841_v8 = vld [vmem:[%s1154_s1 + $0x28] ss:$16 sps:$4 sm:$0xff]   ;;  %v842_v9 = vld [vmem:[%s1154_s1 + $0x44] ss:$16 sps:$4 sm:$0xff]  }
   0x4   :  { %245 = vmatprep.subr.bf16.mxu0 %v836_v5  ;;  %288 = vmatprep.subr.bf16.mxu1 %v838_v6  ;;  %v844_v10 = vld [vmem:[%s1154_s1 + $0x4c] ss:$16 sps:$4 sm:$0xff]   ;;  %v846_v11 = vld [vmem:[%s1154_s1 + $0x40] ss:$16 sps:$4 sm:$0xff]   ;;  %v847_v12 = vld [vmem:[%s1154_s1 + $0x48] ss:$16 sps:$4 sm:$0xff]  }
   0x5   :  { %v848_v13 = vld [vmem:[%s1154_s1 + $0x64] ss:$16 sps:$4 sm:$0xff]   ;;  %v850_v14 = vld [vmem:[%s1154_s1 + $0x6c] ss:$16 sps:$4 sm:$0xff]   ;;  %v852_v15 = vld [vmem:[%s1154_s1 + $0x60] ss:$16 sps:$4 sm:$0xff]  }
   0x6   :  { %v853_v16 = vld [vmem:[%s1154_s1 + $0x68] ss:$16 sps:$4 sm:$0xff]   ;;  %v854_v17 = vld [vmem:[%s1154_s1 + $0x84] ss:$16 sps:$4 sm:$0xff]   ;;  %v856_v18 = vld [vmem:[%s1154_s1 + $0x8c] ss:$16 sps:$4 sm:$0xff]  }
   0x7   :  { %246 = vmatpush1.bf16.msra.mxu0 %v840_v7  ;;  %289 = vmatpush1.bf16.msra.mxu1 %v841_v8  ;;  %v858_v19 = vld [vmem:[%s1154_s1 + $0x80] ss:$16 sps:$4 sm:$0xff]   ;;  %v859_v20 = vld [vmem:[%s1154_s1 + $0x88] ss:$16 sps:$4 sm:$0xff]   ;;  %v860_v21 = vld [vmem:[%s1154_s1 + $0xa4] ss:$16 sps:$4 sm:$0xff]  }
   0x8   :  { %247 = vmatprep.subr.bf16.mxu0 %v842_v9  ;;  %290 = vmatprep.subr.bf16.mxu1 %v844_v10  ;;  %v862_v22 = vld [vmem:[%s1154_s1 + $0xac] ss:$16 sps:$4 sm:$0xff]   ;;  %v864_v23 = vld [vmem:[%s1154_s1 + $0xa0] ss:$16 sps:$4 sm:$0xff]   ;;  %v865_v24 = vld [vmem:[%s1154_s1 + $0xa8] ss:$16 sps:$4 sm:$0xff]  }
   0x9   :  { %v866_v25 = vld [vmem:[%s1154_s1 + $0xc4] ss:$16 sps:$4 sm:$0xff]   ;;  %v868_v26 = vld [vmem:[%s1154_s1 + $0xcc] ss:$16 sps:$4 sm:$0xff]   ;;  %v870_v27 = vld [vmem:[%s1154_s1 + $0xc0] ss:$16 sps:$4 sm:$0xff]  }
   0xa   :  { %v871_v28 = vld [vmem:[%s1154_s1 + $0xc8] ss:$16 sps:$4 sm:$0xff]   ;;  %v872_v29 = vld [vmem:[%s1154_s1 + $0xe4] ss:$16 sps:$4 sm:$0xff]   ;;  %v874_v30 = vld [vmem:[%s1154_s1 + $0xec] ss:$16 sps:$4 sm:$0xff]  }
   0xb   :  { %248 = vmatpush1.bf16.msra.mxu0 %v846_v11  ;;  %291 = vmatpush1.bf16.msra.mxu1 %v847_v12  ;;  %v876_v31 = vld [vmem:[%s1154_s1 + $0xe0] ss:$16 sps:$4 sm:$0xff]   ;;  %v877_v32 = vld [vmem:[%s1154_s1 + $0xe8] ss:$16 sps:$4 sm:$0xff]   ;;  %v58_v3 = vshrl.u32 %v57_v2, 7 }
   0xc   :  { %249 = vmatprep.subr.bf16.mxu0 %v848_v13  ;;  %292 = vmatprep.subr.bf16.mxu1 %v850_v14  ;;  %v879_v33 = vld [vmem:[%s1156_s3 + $0x40] sm:$0xff]   ;;  %v883_v38 = vld [vmem:[%s1156_s3 + $0x48] sm:$0xff]   ;;  %v887_v42 = vld [vmem:[%s1156_s3 + $0x50] sm:$0xff]  }
   0xd   :  { %v878_v34 = vld [vmem:[%s1155_s0] sm:$0xff]   ;;  %v884_v39 = vld [vmem:[%s1156_s3 + $0xc8] sm:$0xff]   ;;  %v888_v43 = vld [vmem:[%s1156_s3 + $0xd0] sm:$0xff]   ;;  %v59_v4 = vsub.s32 0, %v58_v3  ;;  %v67_v5 = vsub.s32 2, %v58_v3  ;;  %v63_v7 = vsub.s32 1, %v58_v3 }
   0xe   :  { %v880_v35 = vld [vmem:[%s1156_s3 + $0xc0] sm:$0xff]   ;;  %v885_v40 = vld [vmem:[%s1156_s3 + $0x8] sm:$0xff]   ;;  %v889_v44 = vld [vmem:[%s1156_s3 + $0x10] sm:$0xff]   ;;  %v71_v8 = vsub.s32 3, %v58_v3 }
   0xf   :  { %250 = vmatpush1.bf16.msra.mxu0 %v852_v15  ;;  %293 = vmatpush1.bf16.msra.mxu1 %v853_v16  ;;  %v881_v36 = vld [vmem:[%s1156_s3] sm:$0xff]   ;;  %v886_v41 = vld [vmem:[%s1156_s3 + $0x88] sm:$0xff]   ;;  %v890_v45 = vld [vmem:[%s1156_s3 + $0x90] sm:$0xff]  }
  0x10   :  { %251 = vmatprep.subr.bf16.mxu0 %v854_v17  ;;  %294 = vmatprep.subr.bf16.mxu1 %v856_v18  ;;  %v882_v37 = vld [vmem:[%s1156_s3 + $0x80] sm:$0xff]   ;;  %v891_v46 = vld [vmem:[%s1156_s3 + $0x58] sm:$0xff]   ;;  %v899_v54 = vld [vmem:[%s1156_s3 + $0x68] sm:$0xff]  }
  0x11   :  { %v892_v47 = vld [vmem:[%s1156_s3 + $0xd8] sm:$0xff]   ;;  %v895_v50 = vld [vmem:[%s1156_s3 + $0x60] sm:$0xff]   ;;  %v900_v55 = vld [vmem:[%s1156_s3 + $0xe8] sm:$0xff]  }
  0x12   :  { %v893_v48 = vld [vmem:[%s1156_s3 + $0x18] sm:$0xff]   ;;  %v896_v51 = vld [vmem:[%s1156_s3 + $0xe0] sm:$0xff]   ;;  %v901_v56 = vld [vmem:[%s1156_s3 + $0x28] sm:$0xff]  }
  0x13   :  { %252 = vmatpush1.bf16.msra.mxu0 %v858_v19  ;;  %295 = vmatpush1.bf16.msra.mxu1 %v859_v20  ;;  %v894_v49 = vld [vmem:[%s1156_s3 + $0x98] sm:$0xff]   ;;  %v897_v52 = vld [vmem:[%s1156_s3 + $0x20] sm:$0xff]   ;;  %v902_v57 = vld [vmem:[%s1156_s3 + $0xa8] sm:$0xff]  }
  0x14   :  { %253 = vmatprep.subr.bf16.mxu0 %v860_v21  ;;  %296 = vmatprep.subr.bf16.mxu1 %v862_v22  ;;  %v898_v53 = vld [vmem:[%s1156_s3 + $0xa0] sm:$0xff]   ;;  %v903_v58 = vld [vmem:[%s1156_s3 + $0x70] sm:$0xff]   ;;  %v907_v62 = vld [vmem:[%s1156_s3 + $0x78] sm:$0xff]  }
  0x15   :  { %v904_v59 = vld [vmem:[%s1156_s3 + $0xf0] sm:$0xff]   ;;  %v908_v63 = vld [vmem:[%s1156_s3 + $0xf8] sm:$0xff]   ;;  %v55_v6 = vld [vmem:[%s1157_s2] sm:$0xf] }
  0x16   :  { %v905_v60 = vld [vmem:[%s1156_s3 + $0x30] sm:$0xff]   ;;  %v909_v0 = vld [vmem:[%s1156_s3 + $0x38] sm:$0xff]   ;;  %v60_v9 = vrot.slane %v55_v6, %v59_v4  ;;  %v68_v10 = vrot.slane %v55_v6, %v67_v5  ;;  %v64_v11 = vrot.slane %v55_v6, %v63_v7  ;;  %v72_v12 = vrot.slane %v55_v6, %v71_v8 }
  0x17   :  { %254 = vmatpush1.bf16.msra.mxu0 %v864_v23  ;;  %297 = vmatpush1.bf16.msra.mxu1 %v865_v24  ;;  %v906_v61 = vld [vmem:[%s1156_s3 + $0xb0] sm:$0xff]   ;;  %v910_v1 = vld [vmem:[%s1156_s3 + $0xb8] sm:$0xff]  }
  0x18   :  { %255 = vmatprep.subr.bf16.mxu0 %v866_v25  ;;  %298 = vmatprep.subr.bf16.mxu1 %v868_v26 }
  0x1b   :  { %256 = vmatpush1.bf16.msra.mxu0 %v870_v27  ;;  %299 = vmatpush1.bf16.msra.mxu1 %v871_v28 }
  0x1c   :  { %257 = vmatprep.subr.bf16.mxu0 %v872_v29  ;;  %300 = vmatprep.subr.bf16.mxu1 %v874_v30 }
  0x1f   :  { %258 = vmatpush1.bf16.msra.mxu0 %v876_v31  ;;  %301 = vmatpush1.bf16.msra.mxu1 %v877_v32 }
  0x20   :  { %782 = vmatprep.subr.bf16.mxu0 %v879_v33  ;;  %804 = vmatprep.subr.bf16.mxu1 %v880_v35 }
  0x22   :  { %276 = vmatmul.mubr.bf16.vlgmr.msra.gmra.mrb[0].mxu0 %v878_v34  ;;  %319 = vmatmul.mubr.bf16.vlgmr.msra.gmra.mrb[0].mxu1 %v878_v34 }
  0x23   :  { %783 = vmatpush3.bf16.msra.mxu0 %v881_v36  ;;  %805 = vmatpush3.bf16.msra.mxu1 %v882_v37 }
  0x24   :  { %784 = vmatprep.subr.bf16.mxu0 %v883_v38  ;;  %806 = vmatprep.subr.bf16.mxu1 %v884_v39 }
  0x27   :  { %785 = vmatpush3.bf16.msra.mxu0 %v885_v40  ;;  %807 = vmatpush3.bf16.msra.mxu1 %v886_v41  ;;  %v912_v41 = vmov 6  }
  0x28   :  { %786 = vmatprep.subr.bf16.mxu0 %v887_v42  ;;  %808 = vmatprep.subr.bf16.mxu1 %v888_v43 }
  0x29   :  { %828 = vset.pattern.permute.xlu1 %v912_v41  ;;  %829 = vset.pattern.permute.xlu0 %v912_v41 }
  0x2b   :  { %787 = vmatpush3.bf16.msra.mxu0 %v889_v44  ;;  %809 = vmatpush3.bf16.msra.mxu1 %v890_v45  ;;  %v749_v44 = vld [vmem:[%s1158_s4] ss:$0 sm:$0xff] }
  0x2c   :  { %788 = vmatprep.subr.bf16.mxu0 %v891_v46  ;;  %810 = vmatprep.subr.bf16.mxu1 %v892_v47 }
  0x2f   :  { %789 = vmatpush3.bf16.msra.mxu0 %v893_v48  ;;  %811 = vmatpush3.bf16.msra.mxu1 %v894_v49 }
  0x30   :  { %790 = vmatprep.subr.bf16.mxu0 %v895_v50  ;;  %812 = vmatprep.subr.bf16.mxu1 %v896_v51 }
  0x33   :  { %791 = vmatpush3.bf16.msra.mxu0 %v897_v52  ;;  %813 = vmatpush3.bf16.msra.mxu1 %v898_v53 }
  0x34   :  { %792 = vmatprep.subr.bf16.mxu0 %v899_v54  ;;  %814 = vmatprep.subr.bf16.mxu1 %v900_v55 }
  0x37   :  { %793 = vmatpush3.bf16.msra.mxu0 %v901_v56  ;;  %815 = vmatpush3.bf16.msra.mxu1 %v902_v57 }
  0x38   :  { %794 = vmatprep.subr.bf16.mxu0 %v903_v58  ;;  %816 = vmatprep.subr.bf16.mxu1 %v904_v59 }
  0x3b   :  { %795 = vmatpush3.bf16.msra.mxu0 %v905_v60  ;;  %817 = vmatpush3.bf16.msra.mxu1 %v906_v61 }
  0x3c   :  { %796 = vmatprep.subr.bf16.mxu0 %v907_v62  ;;  %818 = vmatprep.subr.bf16.mxu1 %v908_v63 }
  0x3f   :  { %797 = vmatpush3.bf16.msra.mxu0 %v909_v0  ;;  %819 = vmatpush3.bf16.msra.mxu1 %v910_v1 }
  0xf5   :  { %v277_v13 = vpop.f32.mrb[0].mxu0  ;;  %v320_v14 = vpop.f32.mrb[0].mxu1 }
  0xf6   :  { %v278_v15 = vadd.f32 %v277_v13, %v60_v9  ;;  %v321_v16 = vadd.f32 %v320_v14, %v68_v10  ;;  %v279_v17 = vpop.f32.mrb[1].mxu0  ;;  %v322_v18 = vpop.f32.mrb[1].mxu1 }
  0xf7   :  { %v280_v19 = vadd.f32 %v279_v17, %v64_v11  ;;  %v323_v20 = vadd.f32 %v322_v18, %v72_v12  ;;  %v281_v21 = vpop.f32.mrb[2].mxu0  ;;  %v324_v22 = vpop.f32.mrb[2].mxu1 }
  0xf8   :  { %v331_v23 = vmax.f32 %v321_v16, 0.0  ;;  %v282_v24 = vadd.f32 %v281_v21, %v60_v9  ;;  %v325_v25 = vadd.f32 %v324_v22, %v68_v10  ;;  %v283_v26 = vpop.f32.mrb[3].mxu0  ;;  %v326_v27 = vpop.f32.mrb[3].mxu1  ;;  %v329_v31 = vmax.f32 %v278_v15, 0.0 }
  0xf9   :  { %v332_v28 = vmax.f32 %v323_v20, 0.0  ;;  %v284_v29 = vadd.f32 %v283_v26, %v64_v11  ;;  %v327_v30 = vadd.f32 %v326_v27, %v72_v12  ;;  %v330_v34 = vmax.f32 %v280_v19, 0.0 }
  0xfa   :  { %v333_v32 = vmax.f32 %v282_v24, 0.0  ;;  %v335_v33 = vmax.f32 %v325_v25, 0.0 }
  0xfb   :  { %v334_v35 = vmax.f32 %v284_v29, 0.0  ;;  %v336_v36 = vmax.f32 %v327_v30, 0.0 }
  0xfc   :  { %v337_v37 = vpack.c.bf16 %v333_v32, %v329_v31  ;;  %v339_v38 = vpack.c.bf16 %v335_v33, %v331_v23 }
  0xfd   :  { %v338_v39 = vpack.c.bf16 %v334_v35, %v330_v34  ;;  %v340_v40 = vpack.c.bf16 %v336_v36, %v332_v28 }
  0xff   :  { %636 = vmatprep.mubr.bf16.mxu0 %v338_v39  ;;  %677 = vmatprep.mubr.bf16.mxu1 %v340_v40 }
 0x100   :  { %637 = vmatmul.mubr.bf16.vlgmr.msra.gmra.mrb[4].mxu0 %v337_v37  ;;  %678 = vmatmul.mubr.bf16.vlgmr.msra.gmra.mrb[4].mxu1 %v339_v38 }
 0x1d3   :  { %v798_v42 = vpop.f32.mrb[4].mxu0  ;;  %v820_v43 = vpop.f32.mrb[4].mxu1 }
 0x1d4   :  { %v799_v45 = vpop.f32.mrb[5].mxu0  ;;  %v821_v46 = vpop.f32.mrb[5].mxu1 }
 0x1d5   :  { %v800_v47 = vadd.f32 %v799_v45, %v798_v42  ;;  %v822_v48 = vadd.f32 %v821_v46, %v820_v43  ;;  %v801_v49 = vpop.f32.mrb[6].mxu0  ;;  %v823_v50 = vpop.f32.mrb[6].mxu1 }
 0x1d6   :  { %v802_v51 = vpop.f32.mrb[7].mxu0  ;;  %v824_v52 = vpop.f32.mrb[7].mxu1 }
 0x1d7   :  { %v639_v53 = vadd.f32 %v800_v47, %v749_v44  ;;  %v803_v54 = vadd.f32 %v802_v51, %v801_v49  ;;  %v825_v55 = vadd.f32 %v824_v52, %v823_v50 }
 0x1d9   :  { %v680_v56 = vadd.f32 %v822_v48, %v639_v53  ;;  %v642_v57 = vadd.f32 %v803_v54, %v749_v44 }
 0x1db   :  { %v683_v58 = vadd.f32 %v825_v55, %v642_v57  ;;  %700 = vperm.xlu1 %828, %v680_v56   ;;  %v687_v59 = vsel %vm686_vm0, %v680_v56, 0.0 }
 0x1dc   :  { %688 = vadd.xlane.f32.xlu0 %v687_v59 }
 0x1dd   :  { %v690_v60 = vsel %vm686_vm0, %v683_v58, 0.0 }
 0x1df   :  { %705 = vperm.xlu1 %828, %v683_v58  }
 0x1e0   :  { %691 = vadd.xlane.f32.xlu0 %v690_v60 }
 0x25a   :  { %v701_v63 = vpop.permute.xlu1 %700 }
 0x25e   :  { %v706_v5 = vpop.permute.xlu1 %705 }
 0x269   :  { %v689_v61 = vpop.xlane.xlu0 %688 }
 0x26a   :  { %v694_v62 = vmul.f32 0.16666667, %v689_v61 }
 0x26c   :  { %v696_v0 = vsub.f32 %v680_v56, %v694_v62 }
 0x26d   :  { %v692_v1 = vpop.xlane.xlu0 %691 }
 0x26e   :  { %v708_v2 = vadd.f32 %v701_v63, %v696_v0  ;;  %v695_v3 = vmul.f32 0.16666667, %v692_v1 }
 0x270   :  { %710 = vst.msk [vmem:[%s1159_s5] sm:$0xff] %vm686_vm0, %v708_v2  ;;  %v697_v4 = vsub.f32 %v683_v58, %v695_v3 }
 0x272   :  { %v709_v6 = vadd.f32 %v706_v5, %v697_v4 }
 0x274   :  { %711 = vst.msk [vmem:[%s1159_s5 + $0x8] sm:$0xff] %vm686_vm0, %v709_v6 }

</bundles_post_ra>
